<compile_context>
chip_gen: v6e
topology: v6e:2x2x1
jax: 0.10.0
libtpu: 0.0.40
codegen_flags: <defaults>
</compile_context>

<pallas_src>
import functools

import jax
import jax.numpy as jnp
from jax.experimental import pallas as pl
from jax.experimental.pallas import tpu as pltpu


# ---------------------------------------------------------------------------
# Kernels
# ---------------------------------------------------------------------------
def _crop_kernel_3d(x_ref, o_ref, *, r, c, H, W):
    # x_ref block: (T, H, W)  ->  o_ref block: (T, H-2r, W-2c)
    # r, c, H, W are Python ints => static sub-tile copy.
    o_ref[...] = x_ref[:, r:H - r, c:W - c]


def _crop_kernel_rows_flat(x_ref, o_ref, *, start, size):
    # Row-only crop on a flattened plane.
    # x_ref block: (T, H*W)  ->  o_ref block: (T, Ho*W); the crop is a single
    # contiguous window along the (lane-dense) last dim.
    o_ref[...] = x_ref[:, start:start + size]


# ---------------------------------------------------------------------------
# Tiling helper
# ---------------------------------------------------------------------------
def _pick_tile(num_planes, block_elems, itemsize, budget_bytes, sublane_multiple=None):
    """Largest T dividing num_planes with T*block_elems*itemsize <= budget.

    If `sublane_multiple` is given (2-D path, T is the second-minor block dim),
    additionally require T % sublane_multiple == 0 unless T == num_planes
    (the full-dim escape of the (8,128) rule).  Returns None if impossible.
    """
    bytes_per_plane = block_elems * itemsize
    max_t = min(num_planes, max(1, budget_bytes // bytes_per_plane))
    if max_t >= num_planes:
        return num_planes
    for t in range(max_t, 0, -1):
        if num_planes % t:
            continue
        if sublane_multiple is None or t % sublane_multiple == 0:
            return t
    return None


_VMEM_LIMIT = 32 << 20          # scoped VMEM limit (raises v5e's 16 MiB default)
_BLOCK_BUDGET = 4 << 20         # per input block; <= ~16 MiB double-buffered total


# ---------------------------------------------------------------------------
# Wrapper (forward pass of CropLayer)
# ---------------------------------------------------------------------------
def crop_layer(x, crop_set, *, block_budget_bytes=_BLOCK_BUDGET):
    """JAX/Pallas equivalent of CropLayer(crop_set).forward(x)."""
    rows_to_crop = -crop_set[0]
    cols_to_crop = -crop_set[1]
    assert rows_to_crop >= 0
    assert cols_to_crop >= 0

    N, C, H, W = x.shape
    Ho = H - 2 * rows_to_crop
    Wo = W - 2 * cols_to_crop
    assert Ho > 0 and Wo > 0

    if rows_to_crop == 0 and cols_to_crop == 0:
        # Identity branch of the PyTorch module.
        return x

    P = N * C
    itemsize = jnp.dtype(x.dtype).itemsize
    sublane = max(8, 32 // itemsize)  # 8 for f32, 16 for bf16, 32 for int8/fp8
    compiler_params = pltpu.CompilerParams(
        dimension_semantics=("parallel",),   # shards across 2 TCs on v7x
        vmem_limit_bytes=_VMEM_LIMIT,
    )

    # ---- Fast, lane-dense path: row-only crop (cols_to_crop == 0). --------
    if cols_to_crop == 0:
        T = _pick_tile(P, H * W, itemsize, block_budget_bytes, sublane_multiple=sublane)
        if T is not None:
            x2 = x.reshape(P, H * W)                      # free contiguous reshape
            kernel = functools.partial(
                _crop_kernel_rows_flat, start=rows_to_crop * W, size=Ho * W
            )
            out = pl.pallas_call(
                kernel,
                out_shape=jax.ShapeDtypeStruct((P, Ho * W), x.dtype),
                grid_spec=pltpu.PrefetchScalarGridSpec(
                    num_scalar_prefetch=0,
                    grid=(P // T,),
                    in_specs=[pl.BlockSpec((T, H * W), lambda i: (i, 0))],
                    out_specs=pl.BlockSpec((T, Ho * W), lambda i: (i, 0)),
                ),
                compiler_params=compiler_params,
                cost_estimate=pl.CostEstimate(
                    flops=0,
                    transcendentals=0,
                    bytes_accessed=P * (H * W + Ho * W) * itemsize,
                ),
            )(x2)
            return out.reshape(N, C, Ho, W)
        # else: fall through to the general 3-D path.

    # ---- General path: (T, H, W) -> (T, Ho, Wo). ---------------------------
    T = _pick_tile(P, H * W, itemsize, block_budget_bytes, sublane_multiple=None)
    x3 = x.reshape(P, H, W)                               # free contiguous reshape
    kernel = functools.partial(
        _crop_kernel_3d, r=rows_to_crop, c=cols_to_crop, H=H, W=W
    )
    out = pl.pallas_call(
        kernel,
        out_shape=jax.ShapeDtypeStruct((P, Ho, Wo), x.dtype),
        grid_spec=pltpu.PrefetchScalarGridSpec(
            num_scalar_prefetch=0,
            grid=(P // T,),
            in_specs=[pl.BlockSpec((T, H, W), lambda i: (i, 0, 0))],
            out_specs=pl.BlockSpec((T, Ho, Wo), lambda i: (i, 0, 0)),
        ),
        compiler_params=compiler_params,
        cost_estimate=pl.CostEstimate(
            flops=0,
            transcendentals=0,
            bytes_accessed=P * (H * W + Ho * Wo) * itemsize,
        ),
    )(x3)
    return out.reshape(N, C, Ho, Wo)


# ---------------------------------------------------------------------------
# Reference (identical to the PyTorch forward) + self-test
# ---------------------------------------------------------------------------
def _crop_ref(x, crop_set):
    r, c = -crop_set[0], -crop_set[1]
    if r == 0 and c == 0:
        return x
    elif r > 0 and c == 0:
        return x[:, :, r:-r, :]
    elif r == 0 and c > 0:
        return x[:, :, :, c:-c]
    else:
        return x[:, :, r:-r, c:-c]


if __name__ == "__main__":
    key = jax.random.PRNGKey(0)

    # Small canonical shapes.
    N, C, H, W = 2, 4, 16, 16
    x = jax.random.normal(key, (N, C, H, W), dtype=jnp.float32)

    # (x, crop_set, block_budget) — exercises all module branches plus the
    # multi-block grid of both the flattened and the 3-D kernel paths.
    x_big = jax.random.normal(jax.random.PRNGKey(0), (2, 16, 16, 16), dtype=jnp.float32)
    cases = [
        (x, (-1, -1), _BLOCK_BUDGET),   # rows+cols crop, single block
        (x, (-2, 0), _BLOCK_BUDGET),    # row-only crop, lane-dense path
        (x, (0, -3), _BLOCK_BUDGET),    # col-only crop
        (x, (0, 0), _BLOCK_BUDGET),     # identity
        (x_big, (-2, 0), 8 * 1024),     # row-only crop, tiled grid (T < N*C)
        (x, (-1, -2), 2 * 1024),        # general crop, tiled grid (T < N*C)
    ]

    for xin, crop_set, budget in cases:
        out = crop_layer(xin, crop_set, block_budget_bytes=budget)
        jax.block_until_ready(out)
        ref = _crop_ref(xin, crop_set)
        assert out.shape == ref.shape, (crop_set, out.shape, ref.shape)
        assert jnp.array_equal(out, ref), f"mismatch for crop_set={crop_set}"

    print("KERNEL_OK")
</pallas_src>

<mosaic_0001>
module attributes {stable_mosaic.version = 11 : i64} {
  func.func @_crop_kernel_3d(%arg0: i32, %arg1: memref<8x16x16xf32, #tpu.memory_space<vmem>>, %arg2: memref<8x14x14xf32, #tpu.memory_space<vmem>>) attributes {dimension_semantics = [#tpu.dimension_semantics<parallel>], iteration_bounds = array<i64: 1>, scalar_prefetch = 0 : i64, scratch_operands = 0 : i64, tpu.core_type = #tpu.core_type<tc>, window_params = [{transform_indices = @transform_0, window_bounds = array<i64: 8, 16, 16>}, {transform_indices = @transform_1, window_bounds = array<i64: 8, 14, 14>}]} {
    %c0 = arith.constant 0 : index
    %c1 = arith.constant 1 : index
    %c1_0 = arith.constant 1 : index
    %0 = vector.load %arg1[%c0, %c1, %c1_0] : memref<8x16x16xf32, #tpu.memory_space<vmem>>, vector<8x14x14xf32>
    %c0_1 = arith.constant 0 : index
    %c0_2 = arith.constant 0 : index
    %c0_3 = arith.constant 0 : index
    %1 = vector.load %arg2[%c0_1, %c0_2, %c0_3] : memref<8x14x14xf32, #tpu.memory_space<vmem>>, vector<8x14x14xf32>
    tpu.vector_store %arg2[%c0_1, %c0_2, %c0_3], %0 {strides = array<i32>} : memref<8x14x14xf32, #tpu.memory_space<vmem>>, vector<8x14x14xf32>,
    return
  }
  func.func @transform_0(%arg0: i32) -> (i32, i32, i32) {
    %c0_i32 = arith.constant 0 : i32
    %c0_i32_0 = arith.constant 0 : i32
    %c0_i32_1 = arith.constant 0 : i32
    return %arg0, %c0_i32, %c0_i32_0 : i32, i32, i32
  }
  func.func @transform_1(%arg0: i32) -> (i32, i32, i32) {
    %c0_i32 = arith.constant 0 : i32
    %c0_i32_0 = arith.constant 0 : i32
    %c0_i32_1 = arith.constant 0 : i32
    return %arg0, %c0_i32, %c0_i32_0 : i32, i32, i32
  }
}

</mosaic_0001>

<bundles_post_ra>
// kernel: tpu_custom_call.1
= control target key start
LH: loop header
LB: loop body
LE: loop exit
PB: predicated region body
PF: predicated region fallthrough
CT: control target
= control target key end

     0   :  { %6 = vsyncpa [#allocation3], 0  ;;  %s151_s6 = smov [#allocation2]   ;;  %s232_s0 = inlined_call_operand.hbm [shape: f32[8,16,16], index: 0, kind: input, shape index: {}]   ;;  %s233_s1 = inlined_call_operand.vmem [shape: f32[8,14,14], index: 1, kind: output, shape index: {}]  }
   0x1   :  { %s12_s7 = sshll.u32 %s151_s6, 4  ;;  %s13_s7 = int_to_ptr.vmem [resolvable:$true] %s12_s7 }
   0x2   :  { %s137_s8 = scalar_lea.vmem %s13_s7, 2048  ;;  %p142_p1 = scmp.lt.s32.totalorder %s13_s7, %s13_s7 }
   0x3   :  { %p138_p0 = scmp.ne.s32.totalorder %s13_s7, %s137_s8  ;;  %p143_p2 = scmp.lt.s32.totalorder %s137_s8, %s137_s8 }
   0x5   :  { %p144_p3 = por %p143_p2, %p142_p1 }
   0x7   :  { %p145_p4 = pnand %p144_p3, %p138_p0 }
   0x9   :  { %148 = shalt.err (!%p145_p4)
}
   0xa   :  { %s152_s9 = smov 128   ;;  %s153_s10 = smov 8  }
   0xb   :  { %18 = dma.hbm_to_vmem [thread:$0]  %s232_s0, 2048, %s13_s7, [#allocation3], %s152_s9, %s152_s9, %s153_s10  }
   0xc   :  { %149 = dma.done.wait [#allocation3], 2048  }
   0xd   :  { %150 = vsyncadd [#allocation3], 4294965248  ;;  %v24_v0 = vld [vmem:[#allocation2 + $0x11] sm:$0xff]  ;;  %v22_v1 = vld [vmem:[#allocation2 + $0x1] sm:$0xff]  ;;  %s154_s13 = smov 127   ;;  %vm102_vm0 = vcmask 113664  }
   0xe   :  { %58 = vrot.lane.b32.xlu1 %v24_v0, %s154_s13  ;;  %54 = vrot.lane.b32.xlu0 %v22_v1, %s154_s13  ;;  %v25_v2 = vld [vmem:[#allocation2 + $0x19] sm:$0x3f]  ;;  %v23_v3 = vld [vmem:[#allocation2 + $0x9] sm:$0x3f]  ;;  %v26_v5 = vld [vmem:[#allocation2 + $0x21] sm:$0xff]  ;;  %vm104_vm1 = vcmask 111616  }
   0xf   :  { %v27_v4 = vld [vmem:[#allocation2 + $0x29] sm:$0x3f]  ;;  %v29_v6 = vld [vmem:[#allocation2 + $0x39] sm:$0x3f]  ;;  %v28_v7 = vld [vmem:[#allocation2 + $0x31] sm:$0xff] }
  0x10   :  { %v31_v8 = vld [vmem:[#allocation2 + $0x49] sm:$0x3f]  ;;  %v30_v9 = vld [vmem:[#allocation2 + $0x41] sm:$0xff]  ;;  %v33_v10 = vld [vmem:[#allocation2 + $0x59] sm:$0x3f] }
  0x11   :  { %v32_v11 = vld [vmem:[#allocation2 + $0x51] sm:$0xff]  ;;  %v35_v12 = vld [vmem:[#allocation2 + $0x69] sm:$0x3f]  ;;  %v34_v13 = vld [vmem:[#allocation2 + $0x61] sm:$0xff] }
  0x12   :  { %60 = vrot.lane.b32.xlu1 %v25_v2, %s154_s13  ;;  %56 = vrot.lane.b32.xlu0 %v23_v3, %s154_s13  ;;  %v37_v14 = vld [vmem:[#allocation2 + $0x79] sm:$0x3f]  ;;  %v36_v15 = vld [vmem:[#allocation2 + $0x71] sm:$0xff] }
  0x16   :  { %64 = vrot.lane.b32.xlu1 %v27_v4, %s154_s13  ;;  %62 = vrot.lane.b32.xlu0 %v26_v5, %s154_s13 }
  0x1a   :  { %68 = vrot.lane.b32.xlu1 %v29_v6, %s154_s13  ;;  %66 = vrot.lane.b32.xlu0 %v28_v7, %s154_s13 }
  0x1e   :  { %72 = vrot.lane.b32.xlu1 %v31_v8, %s154_s13  ;;  %70 = vrot.lane.b32.xlu0 %v30_v9, %s154_s13 }
  0x22   :  { %76 = vrot.lane.b32.xlu1 %v33_v10, %s154_s13  ;;  %74 = vrot.lane.b32.xlu0 %v32_v11, %s154_s13 }
  0x26   :  { %80 = vrot.lane.b32.xlu1 %v35_v12, %s154_s13  ;;  %78 = vrot.lane.b32.xlu0 %v34_v13, %s154_s13 }
  0x2a   :  { %84 = vrot.lane.b32.xlu1 %v37_v14, %s154_s13  ;;  %82 = vrot.lane.b32.xlu0 %v36_v15, %s154_s13 }
  0x80   :  { %v59_v16 = vpop.permute.xlu1 %58  ;;  %v55_v17 = vpop.permute.xlu0 %54 }
  0x81   :  { %106 = vst.msk [vmem:[%s233_s1 + $0x10] sm:$0xff] %vm102_vm0, %v59_v16  ;;  %103 = vst.msk [vmem:[%s233_s1] sm:$0xff] %vm102_vm0, %v55_v17 }
  0x84   :  { %v61_v18 = vpop.permute.xlu1 %60  ;;  %v57_v19 = vpop.permute.xlu0 %56 }
  0x85   :  { %107 = vst.msk [vmem:[%s233_s1 + $0x18] sm:$0x3f] %vm104_vm1, %v61_v18  ;;  %105 = vst.msk [vmem:[%s233_s1 + $0x8] sm:$0x3f] %vm104_vm1, %v57_v19 }
  0x88   :  { %v65_v20 = vpop.permute.xlu1 %64  ;;  %v63_v21 = vpop.permute.xlu0 %62 }
  0x89   :  { %109 = vst.msk [vmem:[%s233_s1 + $0x28] sm:$0x3f] %vm104_vm1, %v65_v20 }
  0x8a   :  { %108 = vst.msk [vmem:[%s233_s1 + $0x20] sm:$0xff] %vm102_vm0, %v63_v21 }
  0x8c   :  { %v69_v22 = vpop.permute.xlu1 %68  ;;  %v67_v23 = vpop.permute.xlu0 %66 }
  0x8d   :  { %111 = vst.msk [vmem:[%s233_s1 + $0x38] sm:$0x3f] %vm104_vm1, %v69_v22 }
  0x8e   :  { %110 = vst.msk [vmem:[%s233_s1 + $0x30] sm:$0xff] %vm102_vm0, %v67_v23 }
  0x90   :  { %v73_v24 = vpop.permute.xlu1 %72  ;;  %v71_v25 = vpop.permute.xlu0 %70 }
  0x91   :  { %113 = vst.msk [vmem:[%s233_s1 + $0x48] sm:$0x3f] %vm104_vm1, %v73_v24 }
  0x92   :  { %112 = vst.msk [vmem:[%s233_s1 + $0x40] sm:$0xff] %vm102_vm0, %v71_v25 }
  0x94   :  { %v77_v26 = vpop.permute.xlu1 %76  ;;  %v75_v27 = vpop.permute.xlu0 %74 }
  0x95   :  { %115 = vst.msk [vmem:[%s233_s1 + $0x58] sm:$0x3f] %vm104_vm1, %v77_v26 }
  0x96   :  { %114 = vst.msk [vmem:[%s233_s1 + $0x50] sm:$0xff] %vm102_vm0, %v75_v27 }
  0x98   :  { %v81_v28 = vpop.permute.xlu1 %80  ;;  %v79_v29 = vpop.permute.xlu0 %78 }
  0x99   :  { %117 = vst.msk [vmem:[%s233_s1 + $0x68] sm:$0x3f] %vm104_vm1, %v81_v28 }
  0x9a   :  { %116 = vst.msk [vmem:[%s233_s1 + $0x60] sm:$0xff] %vm102_vm0, %v79_v29 }
  0x9c   :  { %v85_v30 = vpop.permute.xlu1 %84  ;;  %v83_v31 = vpop.permute.xlu0 %82 }
  0x9d   :  { %119 = vst.msk [vmem:[%s233_s1 + $0x78] sm:$0x3f] %vm104_vm1, %v85_v30 }
  0x9e   :  { %118 = vst.msk [vmem:[%s233_s1 + $0x70] sm:$0xff] %vm102_vm0, %v83_v31 }
  0x9f   :  { %124 = vsyncpa [#allocation3], 1 }

</bundles_post_ra>
